<compile_context>
chip_gen: v5e
topology: v5e:2x2
jax: 0.10.0
libtpu: 0.0.40
codegen_flags: <defaults>
</compile_context>

<pallas_src>
import functools

import jax
import jax.numpy as jnp
from jax.experimental import pallas as pl
from jax.experimental.pallas import tpu as pltpu


# ---------------------------------------------------------------------------
# Model hyperparameters (small, consistent with the module's __init__ shapes)
# ---------------------------------------------------------------------------
BATCH = 2
SEQ = 8
DIM_MODEL = 32
NUM_HEADS = 4
DIM_K = DIM_MODEL // NUM_HEADS          # = dim_v = 8
DIM_V = DIM_K
DIM_FF = 64
LN_EPS = 1e-6

# MXU operand dtype.  bf16 is MXU-native on v5e/v6e/v7x (f32 costs multiple passes)
# and halves weight DMA bytes / VMEM residency.  Set to jnp.float32 to recover the
# 1e-5 reference match.
MATMUL_DTYPE = jnp.bfloat16


def _layernorm(x, gamma, beta, eps=LN_EPS):
    """PyTorch nn.LayerNorm semantics (biased variance over last dim), f32 math."""
    mu = jnp.mean(x, axis=-1, keepdims=True)
    var = jnp.mean((x - mu) ** 2, axis=-1, keepdims=True)
    return (x - mu) * jax.lax.rsqrt(var + eps) * gamma + beta


def _encoder_layer_kernel(num_heads, dim_k, seq_len,
                          x_ref, w_ref, w2_ref, b_ref, o_ref):
    n_rows, dim_model = x_ref.shape          # (batch_in_block * seq, dim_model)
    dim_ff = w2_ref.shape[0]
    hk = num_heads * dim_k                   # == dim_model (dim_k = dim_model // heads)
    n_batch = n_rows // seq_len
    mm_dtype = w_ref.dtype                   # MXU operand dtype (bf16 or f32)

    x = x_ref[...]                           # (N, D) flattened slab, f32

    # ---- statically sliced views of the packed weight / bias slabs ----------
    w_qkv = w_ref[:, 0:3 * hk]                           # (D, 3D)  wq | wk | wv
    w_o   = w_ref[:, 3 * hk:3 * hk + dim_model]          # (H*dv, D)
    w_ff1 = w_ref[:, 3 * hk + dim_model:]                # (D, FF)

    b_qkv = b_ref[0:1, 0:3 * hk]
    b_o   = b_ref[1:2, 0:dim_model]
    g1    = b_ref[2:3, 0:dim_model]
    be1   = b_ref[3:4, 0:dim_model]
    b_ff1 = b_ref[4:5, 0:dim_ff]
    b_ff2 = b_ref[5:6, 0:dim_model]
    g2    = b_ref[6:7, 0:dim_model]
    be2   = b_ref[7:8, 0:dim_model]

    # ---- fused Q/K/V projection: one MXU pass with a 3D-wide output ----------
    qkv = jnp.dot(x.astype(mm_dtype), w_qkv,
                  preferred_element_type=jnp.float32) + b_qkv      # (N, 3D) f32

    # Split batch out of the row axis (leading-dim split: free, no relayout).
    q3 = qkv[:, 0:hk].reshape(n_batch, seq_len, hk)
    k3 = qkv[:, hk:2 * hk].reshape(n_batch, seq_len, hk)
    v3 = qkv[:, 2 * hk:3 * hk].reshape(n_batch, seq_len, hk)

    # ---- per-batch attention (batched over B via dot_general; no cross-batch
    #      mask needed), static unroll over heads.  Softmax math stays f32. -----
    scale = 1.0 / jnp.sqrt(jnp.float32(dim_k))
    ctx_heads = []
    for h in range(num_heads):               # static unroll over heads
        sl = slice(h * dim_k, (h + 1) * dim_k)
        q_h = q3[:, :, sl].astype(mm_dtype)                        # (B, S, dk)
        k_h = k3[:, :, sl].astype(mm_dtype)
        v_h = v3[:, :, sl].astype(mm_dtype)
        s = jnp.einsum('bqd,bkd->bqk', q_h, k_h,
                       preferred_element_type=jnp.float32) * scale  # (B, S, S)
        s = s - jnp.max(s, axis=-1, keepdims=True)
        p = jnp.exp(s)
        # approx=True: divide runs on the otherwise-idle EUP slot (~1e-3 rel err).
        p = p * pl.reciprocal(jnp.sum(p, axis=-1, keepdims=True), approx=True)
        ctx_heads.append(
            jnp.einsum('bqk,bkd->bqd', p.astype(mm_dtype), v_h,
                       preferred_element_type=jnp.float32))         # (B, S, dk)

    # Lane-concat heads (stays inside one 128-lane vreg at dk=8, H=4), merge the
    # leading dims back to the flat row axis, then one output projection.
    ctx = jnp.concatenate(ctx_heads, axis=-1).reshape(n_rows, hk)   # (N, H*dv)
    attn = jnp.dot(ctx.astype(mm_dtype), w_o,
                   preferred_element_type=jnp.float32) + b_o        # (N, D)

    # ---- residual + LayerNorm (dropout = identity in eval mode) --------------
    x1 = _layernorm(x + attn, g1, be1)

    # ---- feed-forward ---------------------------------------------------------
    h1 = jnp.dot(x1.astype(mm_dtype), w_ff1,
                 preferred_element_type=jnp.float32) + b_ff1
    h1 = jnp.maximum(h1, 0.0)                # ReLU (f32)
    ffn = jnp.dot(h1.astype(mm_dtype), w2_ref[...],
                  preferred_element_type=jnp.float32) + b_ff2

    o_ref[...] = _layernorm(x1 + ffn, g2, be2).astype(o_ref.dtype)


def transformer_encoder_layer(src, params, *, grid_batches=1):
    """src: (B, S, D) float32.  params: dict of weights (see init_params).

    grid_batches: how many grid steps to split the batch into.  1 (default)
    processes the whole flattened (B*S, D) slab in one step, which is right for
    all generations at these tiny shapes — the kernel is pure fixed overhead, so
    splitting across v7x's two TensorCores would just duplicate the weight DMA.
    Only raise grid_batches (or tile the row axis to ~256-1024 rows per step)
    once per-core work is a few microseconds of real compute.
    """
    B, S, D = src.shape
    assert B % grid_batches == 0
    rows_per_block = (B // grid_batches) * S

    x2d = src.reshape(B * S, D)

    # ---- pack the 17 parameter arrays into 3 slabs (fewer DMAs / BlockSpecs) --
    # Weights go to the MXU operand dtype wrapper-side (halves DMA bytes + VMEM).
    w_slab = jnp.concatenate(
        [params["wq"], params["wk"], params["wv"], params["wo"], params["w1"]],
        axis=1).astype(MATMUL_DTYPE)                     # (D, 3D + D + FF)
    w_ff2 = params["w2"].astype(MATMUL_DTYPE)            # (FF, D)

    pad_w = max(3 * D, DIM_FF)

    def _row(*vs):
        v = jnp.concatenate([jnp.asarray(a).reshape(-1) for a in vs])
        return jnp.pad(v, (0, pad_w - v.shape[0]))[None, :]

    bias_pack = jnp.concatenate([
        _row(params["bq"], params["bk"], params["bv"]),   # row 0: fused qkv bias (3D)
        _row(params["bo"]),                               # row 1
        _row(params["g1"]),                               # row 2
        _row(params["be1"]),                              # row 3
        _row(params["b1"]),                               # row 4 (FF wide)
        _row(params["b2"]),                               # row 5
        _row(params["g2"]),                               # row 6
        _row(params["be2"]),                              # row 7
    ], axis=0).astype(jnp.float32)                        # (8, max(3D, FF)), f32

    kernel = functools.partial(_encoder_layer_kernel, NUM_HEADS, DIM_K, S)

    out2d = pl.pallas_call(
        kernel,
        out_shape=jax.ShapeDtypeStruct((B * S, D), src.dtype),
        grid_spec=pltpu.PrefetchScalarGridSpec(
            num_scalar_prefetch=0,
            grid=(grid_batches,),
            in_specs=[
                pl.BlockSpec((rows_per_block, D), lambda i: (i, 0)),
                pl.BlockSpec(w_slab.shape, lambda i: (0, 0)),
                pl.BlockSpec(w_ff2.shape, lambda i: (0, 0)),
                pl.BlockSpec(bias_pack.shape, lambda i: (0, 0)),
            ],
            out_specs=pl.BlockSpec((rows_per_block, D), lambda i: (i, 0)),
        ),
        # NOTE: VMEM use is trivial at these shapes.  When scaling D/FF (esp. on
        # v7x's 64 MiB VMEM / 32 MiB scoped default) set vmem_limit_bytes, keep
        # the grid-invariant weight specs single-buffered, and tile the FFN over
        # a K/FF grid axis with an f32 VMEM scratch accumulator.
        compiler_params=pltpu.CompilerParams(
            dimension_semantics=("parallel",)),
    )(x2d, w_slab, w_ff2, bias_pack)

    return out2d.reshape(B, S, D)


# ---------------------------------------------------------------------------
# Deterministic parameter init (synthetic; matches module __init__ shapes)
# ---------------------------------------------------------------------------
def init_params(key):
    ks = jax.random.split(key, 12)
    s = 0.05

    def w(k, shape):
        return jax.random.normal(k, shape, jnp.float32) * s

    hk = NUM_HEADS * DIM_K
    hv = NUM_HEADS * DIM_V
    return {
        # per-head Q/K/V Linear(dim_model, dim_k) stacked along output axis
        "wq": w(ks[0], (DIM_MODEL, hk)), "bq": w(ks[1], (1, hk)),
        "wk": w(ks[2], (DIM_MODEL, hk)), "bk": w(ks[3], (1, hk)),
        "wv": w(ks[4], (DIM_MODEL, hv)), "bv": w(ks[5], (1, hv)),
        # MultiHeadAttention output Linear(num_heads*dim_v, dim_model)
        "wo": w(ks[6], (hv, DIM_MODEL)), "bo": w(ks[7], (1, DIM_MODEL)),
        # LayerNorm after attention residual
        "g1": jnp.ones((1, DIM_MODEL), jnp.float32),
        "be1": jnp.zeros((1, DIM_MODEL), jnp.float32),
        # feed_forward: Linear(D, FF) -> ReLU -> Linear(FF, D)
        "w1": w(ks[8], (DIM_MODEL, DIM_FF)), "b1": w(ks[9], (1, DIM_FF)),
        "w2": w(ks[10], (DIM_FF, DIM_MODEL)), "b2": w(ks[11], (1, DIM_MODEL)),
        # LayerNorm after FFN residual
        "g2": jnp.ones((1, DIM_MODEL), jnp.float32),
        "be2": jnp.zeros((1, DIM_MODEL), jnp.float32),
    }


# ---------------------------------------------------------------------------
# Pure-JAX f32 reference (mirrors the PyTorch forward, eval mode)
# ---------------------------------------------------------------------------
def reference(src, p):
    def ln(x, g, b):
        mu = jnp.mean(x, axis=-1, keepdims=True)
        var = jnp.mean((x - mu) ** 2, axis=-1, keepdims=True)
        return (x - mu) / jnp.sqrt(var + LN_EPS) * g + b

    q = src @ p["wq"] + p["bq"]
    k = src @ p["wk"] + p["bk"]
    v = src @ p["wv"] + p["bv"]
    outs = []
    for h in range(NUM_HEADS):
        qh = q[..., h * DIM_K:(h + 1) * DIM_K]
        kh = k[..., h * DIM_K:(h + 1) * DIM_K]
        vh = v[..., h * DIM_V:(h + 1) * DIM_V]
        sc = jnp.einsum("bqd,bkd->bqk", qh, kh) / jnp.sqrt(jnp.float32(DIM_K))
        outs.append(jnp.einsum("bqk,bkd->bqd", jax.nn.softmax(sc, axis=-1), vh))
    attn = jnp.concatenate(outs, axis=-1) @ p["wo"] + p["bo"]
    x1 = ln(src + attn, p["g1"], p["be1"])
    ffn = jnp.maximum(x1 @ p["w1"] + p["b1"], 0.0) @ p["w2"] + p["b2"]
    return ln(x1 + ffn, p["g2"], p["be2"])


if __name__ == "__main__":
    key = jax.random.PRNGKey(0)
    k_src, k_par = jax.random.split(key)
    src = jax.random.normal(k_src, (BATCH, SEQ, DIM_MODEL), jnp.float32)
    params = init_params(k_par)

    out = transformer_encoder_layer(src, params)
    out = jax.block_until_ready(out)

    ref = reference(src, params)
    assert out.shape == (BATCH, SEQ, DIM_MODEL)
    # bf16 MXU operands + approx softmax reciprocal -> relaxed gate (f32 reference).
    # With MATMUL_DTYPE = jnp.float32 this matches to 1e-5.
    assert jnp.allclose(out, ref, atol=2e-2, rtol=2e-2), "mismatch vs reference"
    print("KERNEL_OK")
</pallas_src>

<mosaic_0001>
module attributes {stable_mosaic.version = 11 : i64} {
  func.func @_encoder_layer_kernel(%arg0: i32, %arg1: memref<16x32xf32, #tpu.memory_space<vmem>>, %arg2: memref<32x192xbf16, #tpu.memory_space<vmem>>, %arg3: memref<64x32xbf16, #tpu.memory_space<vmem>>, %arg4: memref<8x96xf32, #tpu.memory_space<vmem>>, %arg5: memref<16x32xf32, #tpu.memory_space<vmem>>) attributes {dimension_semantics = [#tpu.dimension_semantics<parallel>], iteration_bounds = array<i64: 1>, scalar_prefetch = 0 : i64, scratch_operands = 0 : i64, tpu.core_type = #tpu.core_type<tc>, window_params = [{transform_indices = @transform_0, window_bounds = array<i64: 16, 32>}, {pipeline_mode = #tpu.pipeline_mode<synchronous>, transform_indices = @transform_1, window_bounds = array<i64: 32, 192>}, {pipeline_mode = #tpu.pipeline_mode<synchronous>, transform_indices = @transform_2, window_bounds = array<i64: 64, 32>}, {pipeline_mode = #tpu.pipeline_mode<synchronous>, transform_indices = @transform_3, window_bounds = array<i64: 8, 96>}, {transform_indices = @transform_4, window_bounds = array<i64: 16, 32>}]} {
    %c0 = arith.constant 0 : index
    %c0_0 = arith.constant 0 : index
    %0 = vector.load %arg1[%c0, %c0_0] : memref<16x32xf32, #tpu.memory_space<vmem>>, vector<16x32xf32>
    %c0_1 = arith.constant 0 : index
    %c0_2 = arith.constant 0 : index
    %1 = vector.load %arg2[%c0_1, %c0_2] : memref<32x192xbf16, #tpu.memory_space<vmem>>, vector<32x96xbf16>
    %c0_3 = arith.constant 0 : index
    %c96 = arith.constant 96 : index
    %2 = vector.load %arg2[%c0_3, %c96] : memref<32x192xbf16, #tpu.memory_space<vmem>>, vector<32x32xbf16>
    %c0_4 = arith.constant 0 : index
    %c128 = arith.constant 128 : index
    %3 = vector.load %arg2[%c0_4, %c128] : memref<32x192xbf16, #tpu.memory_space<vmem>>, vector<32x64xbf16>
    %c0_5 = arith.constant 0 : index
    %c0_6 = arith.constant 0 : index
    %4 = vector.load %arg4[%c0_5, %c0_6] : memref<8x96xf32, #tpu.memory_space<vmem>>, vector<1x96xf32>
    %c1 = arith.constant 1 : index
    %c0_7 = arith.constant 0 : index
    %5 = vector.load %arg4[%c1, %c0_7] : memref<8x96xf32, #tpu.memory_space<vmem>>, vector<1x32xf32>
    %c2 = arith.constant 2 : index
    %c0_8 = arith.constant 0 : index
    %6 = vector.load %arg4[%c2, %c0_8] : memref<8x96xf32, #tpu.memory_space<vmem>>, vector<1x32xf32>
    %c3 = arith.constant 3 : index
    %c0_9 = arith.constant 0 : index
    %7 = vector.load %arg4[%c3, %c0_9] : memref<8x96xf32, #tpu.memory_space<vmem>>, vector<1x32xf32>
    %c4 = arith.constant 4 : index
    %c0_10 = arith.constant 0 : index
    %8 = vector.load %arg4[%c4, %c0_10] : memref<8x96xf32, #tpu.memory_space<vmem>>, vector<1x64xf32>
    %c5 = arith.constant 5 : index
    %c0_11 = arith.constant 0 : index
    %9 = vector.load %arg4[%c5, %c0_11] : memref<8x96xf32, #tpu.memory_space<vmem>>, vector<1x32xf32>
    %c6 = arith.constant 6 : index
    %c0_12 = arith.constant 0 : index
    %10 = vector.load %arg4[%c6, %c0_12] : memref<8x96xf32, #tpu.memory_space<vmem>>, vector<1x32xf32>
    %c7 = arith.constant 7 : index
    %c0_13 = arith.constant 0 : index
    %11 = vector.load %arg4[%c7, %c0_13] : memref<8x96xf32, #tpu.memory_space<vmem>>, vector<1x32xf32>
    %12 = arith.truncf %0 : vector<16x32xf32> to vector<16x32xbf16>
    %cst = arith.constant dense<0.000000e+00> : vector<16x96xf32>
    %13 = tpu.matmul %12, %1, %cst {dimension_numbers = #tpu.dot_dimension_numbers<[1], [0], [0], [1], [0, 0, 1, 1], [], []>} : vector<16x32xbf16>, vector<32x96xbf16>, vector<16x96xf32> -> vector<16x96xf32>
    %14 = vector.broadcast %4 : vector<1x96xf32> to vector<16x96xf32>
    %15 = arith.addf %13, %14 : vector<16x96xf32>
    %16 = vector.extract_strided_slice %15 {offsets = [0, 0], sizes = [16, 32], strides = [1, 1]} : vector<16x96xf32> to vector<16x32xf32>
    %17 = vector.shape_cast %16 : vector<16x32xf32> to vector<2x8x32xf32>
    %18 = vector.extract_strided_slice %15 {offsets = [0, 32], sizes = [16, 32], strides = [1, 1]} : vector<16x96xf32> to vector<16x32xf32>
    %19 = vector.shape_cast %18 : vector<16x32xf32> to vector<2x8x32xf32>
    %20 = vector.extract_strided_slice %15 {offsets = [0, 64], sizes = [16, 32], strides = [1, 1]} : vector<16x96xf32> to vector<16x32xf32>
    %21 = vector.shape_cast %20 : vector<16x32xf32> to vector<2x8x32xf32>
    %cst_14 = arith.constant 8.000000e+00 : f32
    %22 = math.sqrt %cst_14 : f32
    %cst_15 = arith.constant 1.000000e+00 : f32
    %23 = arith.divf %cst_15, %22 : f32
    %24 = vector.extract_strided_slice %17 {offsets = [0, 0, 0], sizes = [2, 8, 8], strides = [1, 1, 1]} : vector<2x8x32xf32> to vector<2x8x8xf32>
    %25 = arith.truncf %24 : vector<2x8x8xf32> to vector<2x8x8xbf16>
    %26 = vector.extract_strided_slice %19 {offsets = [0, 0, 0], sizes = [2, 8, 8], strides = [1, 1, 1]} : vector<2x8x32xf32> to vector<2x8x8xf32>
    %27 = arith.truncf %26 : vector<2x8x8xf32> to vector<2x8x8xbf16>
    %28 = vector.extract_strided_slice %21 {offsets = [0, 0, 0], sizes = [2, 8, 8], strides = [1, 1, 1]} : vector<2x8x32xf32> to vector<2x8x8xf32>
    %29 = arith.truncf %28 : vector<2x8x8xf32> to vector<2x8x8xbf16>
    "tpu.trace_start"() <{level = 10 : i32, message = "bqd,bkd->bqk"}> : () -> ()
    %cst_16 = arith.constant dense<0.000000e+00> : vector<2x8x8xf32>
    %30 = tpu.matmul %25, %27, %cst_16 {dimension_numbers = #tpu.dot_dimension_numbers<[2], [2], [1], [1], [0, 0, 0, 1, 1, 1], [0], [0]>} : vector<2x8x8xbf16>, vector<2x8x8xbf16>, vector<2x8x8xf32> -> vector<2x8x8xf32>
    "tpu.trace_stop"() : () -> ()
    %31 = vector.broadcast %23 : f32 to vector<2x8x8xf32>
    %32 = arith.mulf %30, %31 : vector<2x8x8xf32>
    %cst_17 = arith.constant dense<0xFF800000> : vector<2x8xf32>
    %33 = vector.multi_reduction <maximumf>, %32, %cst_17 [2] : vector<2x8x8xf32> to vector<2x8xf32>
    %34 = vector.shape_cast %33 : vector<2x8xf32> to vector<2x8x1xf32>
    %35 = vector.broadcast %34 : vector<2x8x1xf32> to vector<2x8x8xf32>
    %36 = arith.subf %32, %35 : vector<2x8x8xf32>
    %37 = math.exp %36 : vector<2x8x8xf32>
    %cst_18 = arith.constant dense<0.000000e+00> : vector<2x8xf32>
    %38 = vector.multi_reduction <add>, %37, %cst_18 [2] : vector<2x8x8xf32> to vector<2x8xf32>
    %39 = vector.shape_cast %38 : vector<2x8xf32> to vector<2x8x1xf32>
    %40 = tpu.reciprocal %39 {approx = true} : vector<2x8x1xf32> -> vector<2x8x1xf32>
    %41 = vector.broadcast %40 : vector<2x8x1xf32> to vector<2x8x8xf32>
    %42 = arith.mulf %37, %41 : vector<2x8x8xf32>
    %43 = arith.truncf %42 : vector<2x8x8xf32> to vector<2x8x8xbf16>
    "tpu.trace_start"() <{level = 10 : i32, message = "bqk,bkd->bqd"}> : () -> ()
    %cst_19 = arith.constant dense<0.000000e+00> : vector<2x8x8xf32>
    %44 = tpu.matmul %43, %29, %cst_19 {dimension_numbers = #tpu.dot_dimension_numbers<[2], [1], [1], [2], [0, 0, 0, 1, 1, 2], [0], [0]>} : vector<2x8x8xbf16>, vector<2x8x8xbf16>, vector<2x8x8xf32> -> vector<2x8x8xf32>
    "tpu.trace_stop"() : () -> ()
    %45 = vector.extract_strided_slice %17 {offsets = [0, 0, 8], sizes = [2, 8, 8], strides = [1, 1, 1]} : vector<2x8x32xf32> to vector<2x8x8xf32>
    %46 = arith.truncf %45 : vector<2x8x8xf32> to vector<2x8x8xbf16>
    %47 = vector.extract_strided_slice %19 {offsets = [0, 0, 8], sizes = [2, 8, 8], strides = [1, 1, 1]} : vector<2x8x32xf32> to vector<2x8x8xf32>
    %48 = arith.truncf %47 : vector<2x8x8xf32> to vector<2x8x8xbf16>
    %49 = vector.extract_strided_slice %21 {offsets = [0, 0, 8], sizes = [2, 8, 8], strides = [1, 1, 1]} : vector<2x8x32xf32> to vector<2x8x8xf32>
    %50 = arith.truncf %49 : vector<2x8x8xf32> to vector<2x8x8xbf16>
    "tpu.trace_start"() <{level = 10 : i32, message = "bqd,bkd->bqk"}> : () -> ()
    %cst_20 = arith.constant dense<0.000000e+00> : vector<2x8x8xf32>
    %51 = tpu.matmul %46, %48, %cst_20 {dimension_numbers = #tpu.dot_dimension_numbers<[2], [2], [1], [1], [0, 0, 0, 1, 1, 1], [0], [0]>} : vector<2x8x8xbf16>, vector<2x8x8xbf16>, vector<2x8x8xf32> -> vector<2x8x8xf32>
    "tpu.trace_stop"() : () -> ()
    %52 = vector.broadcast %23 : f32 to vector<2x8x8xf32>
    %53 = arith.mulf %51, %52 : vector<2x8x8xf32>
    %cst_21 = arith.constant dense<0xFF800000> : vector<2x8xf32>
    %54 = vector.multi_reduction <maximumf>, %53, %cst_21 [2] : vector<2x8x8xf32> to vector<2x8xf32>
    %55 = vector.shape_cast %54 : vector<2x8xf32> to vector<2x8x1xf32>
    %56 = vector.broadcast %55 : vector<2x8x1xf32> to vector<2x8x8xf32>
    %57 = arith.subf %53, %56 : vector<2x8x8xf32>
    %58 = math.exp %57 : vector<2x8x8xf32>
    %cst_22 = arith.constant dense<0.000000e+00> : vector<2x8xf32>
    %59 = vector.multi_reduction <add>, %58, %cst_22 [2] : vector<2x8x8xf32> to vector<2x8xf32>
    %60 = vector.shape_cast %59 : vector<2x8xf32> to vector<2x8x1xf32>
    %61 = tpu.reciprocal %60 {approx = true} : vector<2x8x1xf32> -> vector<2x8x1xf32>
    %62 = vector.broadcast %61 : vector<2x8x1xf32> to vector<2x8x8xf32>
    %63 = arith.mulf %58, %62 : vector<2x8x8xf32>
    %64 = arith.truncf %63 : vector<2x8x8xf32> to vector<2x8x8xbf16>
    "tpu.trace_start"() <{level = 10 : i32, message = "bqk,bkd->bqd"}> : () -> ()
    %cst_23 = arith.constant dense<0.000000e+00> : vector<2x8x8xf32>
    %65 = tpu.matmul %64, %50, %cst_23 {dimension_numbers = #tpu.dot_dimension_numbers<[2], [1], [1], [2], [0, 0, 0, 1, 1, 2], [0], [0]>} : vector<2x8x8xbf16>, vector<2x8x8xbf16>, vector<2x8x8xf32> -> vector<2x8x8xf32>
    "tpu.trace_stop"() : () -> ()
    %66 = vector.extract_strided_slice %17 {offsets = [0, 0, 16], sizes = [2, 8, 8], strides = [1, 1, 1]} : vector<2x8x32xf32> to vector<2x8x8xf32>
    %67 = arith.truncf %66 : vector<2x8x8xf32> to vector<2x8x8xbf16>
    %68 = vector.extract_strided_slice %19 {offsets = [0, 0, 16], sizes = [2, 8, 8], strides = [1, 1, 1]} : vector<2x8x32xf32> to vector<2x8x8xf32>
    %69 = arith.truncf %68 : vector<2x8x8xf32> to vector<2x8x8xbf16>
    %70 = vector.extract_strided_slice %21 {offsets = [0, 0, 16], sizes = [2, 8, 8], strides = [1, 1, 1]} : vector<2x8x32xf32> to vector<2x8x8xf32>
    %71 = arith.truncf %70 : vector<2x8x8xf32> to vector<2x8x8xbf16>
    "tpu.trace_start"() <{level = 10 : i32, message = "bqd,bkd->bqk"}> : () -> ()
    %cst_24 = arith.constant dense<0.000000e+00> : vector<2x8x8xf32>
    %72 = tpu.matmul %67, %69, %cst_24 {dimension_numbers = #tpu.dot_dimension_numbers<[2], [2], [1], [1], [0, 0, 0, 1, 1, 1], [0], [0]>} : vector<2x8x8xbf16>, vector<2x8x8xbf16>, vector<2x8x8xf32> -> vector<2x8x8xf32>
    "tpu.trace_stop"() : () -> ()
    %73 = vector.broadcast %23 : f32 to vector<2x8x8xf32>
    %74 = arith.mulf %72, %73 : vector<2x8x8xf32>
    %cst_25 = arith.constant dense<0xFF800000> : vector<2x8xf32>
    %75 = vector.multi_reduction <maximumf>, %74, %cst_25 [2] : vector<2x8x8xf32> to vector<2x8xf32>
    %76 = vector.shape_cast %75 : vector<2x8xf32> to vector<2x8x1xf32>
    %77 = vector.broadcast %76 : vector<2x8x1xf32> to vector<2x8x8xf32>
    %78 = arith.subf %74, %77 : vector<2x8x8xf32>
    %79 = math.exp %78 : vector<2x8x8xf32>
    %cst_26 = arith.constant dense<0.000000e+00> : vector<2x8xf32>
    %80 = vector.multi_reduction <add>, %79, %cst_26 [2] : vector<2x8x8xf32> to vector<2x8xf32>
    %81 = vector.shape_cast %80 : vector<2x8xf32> to vector<2x8x1xf32>
    %82 = tpu.reciprocal %81 {approx = true} : vector<2x8x1xf32> -> vector<2x8x1xf32>
    %83 = vector.broadcast %82 : vector<2x8x1xf32> to vector<2x8x8xf32>
    %84 = arith.mulf %79, %83 : vector<2x8x8xf32>
    %85 = arith.truncf %84 : vector<2x8x8xf32> to vector<2x8x8xbf16>
    "tpu.trace_start"() <{level = 10 : i32, message = "bqk,bkd->bqd"}> : () -> ()
    %cst_27 = arith.constant dense<0.000000e+00> : vector<2x8x8xf32>
    %86 = tpu.matmul %85, %71, %cst_27 {dimension_numbers = #tpu.dot_dimension_numbers<[2], [1], [1], [2], [0, 0, 0, 1, 1, 2], [0], [0]>} : vector<2x8x8xbf16>, vector<2x8x8xbf16>, vector<2x8x8xf32> -> vector<2x8x8xf32>
    "tpu.trace_stop"() : () -> ()
    %87 = vector.extract_strided_slice %17 {offsets = [0, 0, 24], sizes = [2, 8, 8], strides = [1, 1, 1]} : vector<2x8x32xf32> to vector<2x8x8xf32>
    %88 = arith.truncf %87 : vector<2x8x8xf32> to vector<2x8x8xbf16>
    %89 = vector.extract_strided_slice %19 {offsets = [0, 0, 24], sizes = [2, 8, 8], strides = [1, 1, 1]} : vector<2x8x32xf32> to vector<2x8x8xf32>
    %90 = arith.truncf %89 : vector<2x8x8xf32> to vector<2x8x8xbf16>
    %91 = vector.extract_strided_slice %21 {offsets = [0, 0, 24], sizes = [2, 8, 8], strides = [1, 1, 1]} : vector<2x8x32xf32> to vector<2x8x8xf32>
    %92 = arith.truncf %91 : vector<2x8x8xf32> to vector<2x8x8xbf16>
    "tpu.trace_start"() <{level = 10 : i32, message = "bqd,bkd->bqk"}> : () -> ()
    %cst_28 = arith.constant dense<0.000000e+00> : vector<2x8x8xf32>
    %93 = tpu.matmul %88, %90, %cst_28 {dimension_numbers = #tpu.dot_dimension_numbers<[2], [2], [1], [1], [0, 0, 0, 1, 1, 1], [0], [0]>} : vector<2x8x8xbf16>, vector<2x8x8xbf16>, vector<2x8x8xf32> -> vector<2x8x8xf32>
    "tpu.trace_stop"() : () -> ()
    %94 = vector.broadcast %23 : f32 to vector<2x8x8xf32>
    %95 = arith.mulf %93, %94 : vector<2x8x8xf32>
    %cst_29 = arith.constant dense<0xFF800000> : vector<2x8xf32>
    %96 = vector.multi_reduction <maximumf>, %95, %cst_29 [2] : vector<2x8x8xf32> to vector<2x8xf32>
    %97 = vector.shape_cast %96 : vector<2x8xf32> to vector<2x8x1xf32>
    %98 = vector.broadcast %97 : vector<2x8x1xf32> to vector<2x8x8xf32>
    %99 = arith.subf %95, %98 : vector<2x8x8xf32>
    %100 = math.exp %99 : vector<2x8x8xf32>
    %cst_30 = arith.constant dense<0.000000e+00> : vector<2x8xf32>
    %101 = vector.multi_reduction <add>, %100, %cst_30 [2] : vector<2x8x8xf32> to vector<2x8xf32>
    %102 = vector.shape_cast %101 : vector<2x8xf32> to vector<2x8x1xf32>
    %103 = tpu.reciprocal %102 {approx = true} : vector<2x8x1xf32> -> vector<2x8x1xf32>
    %104 = vector.broadcast %103 : vector<2x8x1xf32> to vector<2x8x8xf32>
    %105 = arith.mulf %100, %104 : vector<2x8x8xf32>
    %106 = arith.truncf %105 : vector<2x8x8xf32> to vector<2x8x8xbf16>
    "tpu.trace_start"() <{level = 10 : i32, message = "bqk,bkd->bqd"}> : () -> ()
    %cst_31 = arith.constant dense<0.000000e+00> : vector<2x8x8xf32>
    %107 = tpu.matmul %106, %92, %cst_31 {dimension_numbers = #tpu.dot_dimension_numbers<[2], [1], [1], [2], [0, 0, 0, 1, 1, 2], [0], [0]>} : vector<2x8x8xbf16>, vector<2x8x8xbf16>, vector<2x8x8xf32> -> vector<2x8x8xf32>
    "tpu.trace_stop"() : () -> ()
    %108 = tpu.concatenate %44, %65, %86, %107 in 2 : vector<2x8x8xf32>, vector<2x8x8xf32>, vector<2x8x8xf32>, vector<2x8x8xf32> -> vector<2x8x32xf32>
    %109 = vector.shape_cast %108 : vector<2x8x32xf32> to vector<16x32xf32>
    %110 = arith.truncf %109 : vector<16x32xf32> to vector<16x32xbf16>
    %cst_32 = arith.constant dense<0.000000e+00> : vector<16x32xf32>
    %111 = tpu.matmul %110, %2, %cst_32 {dimension_numbers = #tpu.dot_dimension_numbers<[1], [0], [0], [1], [0, 0, 1, 1], [], []>} : vector<16x32xbf16>, vector<32x32xbf16>, vector<16x32xf32> -> vector<16x32xf32>
    %112 = vector.broadcast %5 : vector<1x32xf32> to vector<16x32xf32>
    %113 = arith.addf %111, %112 : vector<16x32xf32>
    %114 = arith.addf %0, %113 : vector<16x32xf32>
    %cst_33 = arith.constant dense<0.000000e+00> : vector<16xf32>
    %115 = vector.multi_reduction <add>, %114, %cst_33 [1] : vector<16x32xf32> to vector<16xf32>
    %116 = vector.shape_cast %115 : vector<16xf32> to vector<16x1xf32>
    %cst_34 = arith.constant 3.200000e+01 : f32
    %117 = vector.broadcast %cst_34 : f32 to vector<16x1xf32>
    %118 = arith.divf %116, %117 : vector<16x1xf32>
    %119 = vector.broadcast %118 : vector<16x1xf32> to vector<16x32xf32>
    %120 = arith.subf %114, %119 : vector<16x32xf32>
    %121 = arith.mulf %120, %120 : vector<16x32xf32>
    %cst_35 = arith.constant dense<0.000000e+00> : vector<16xf32>
    %122 = vector.multi_reduction <add>, %121, %cst_35 [1] : vector<16x32xf32> to vector<16xf32>
    %123 = vector.shape_cast %122 : vector<16xf32> to vector<16x1xf32>
    %cst_36 = arith.constant 3.200000e+01 : f32
    %124 = vector.broadcast %cst_36 : f32 to vector<16x1xf32>
    %125 = arith.divf %123, %124 : vector<16x1xf32>
    %126 = vector.broadcast %118 : vector<16x1xf32> to vector<16x32xf32>
    %127 = arith.subf %114, %126 : vector<16x32xf32>
    %cst_37 = arith.constant 9.99999997E-7 : f32
    %128 = vector.broadcast %cst_37 : f32 to vector<16x1xf32>
    %129 = arith.addf %125, %128 : vector<16x1xf32>
    %130 = math.rsqrt %129 : vector<16x1xf32>
    %131 = vector.broadcast %130 : vector<16x1xf32> to vector<16x32xf32>
    %132 = arith.mulf %127, %131 : vector<16x32xf32>
    %133 = vector.broadcast %6 : vector<1x32xf32> to vector<16x32xf32>
    %134 = arith.mulf %132, %133 : vector<16x32xf32>
    %135 = vector.broadcast %7 : vector<1x32xf32> to vector<16x32xf32>
    %136 = arith.addf %134, %135 : vector<16x32xf32>
    %137 = arith.truncf %136 : vector<16x32xf32> to vector<16x32xbf16>
    %cst_38 = arith.constant dense<0.000000e+00> : vector<16x64xf32>
    %138 = tpu.matmul %137, %3, %cst_38 {dimension_numbers = #tpu.dot_dimension_numbers<[1], [0], [0], [1], [0, 0, 1, 1], [], []>} : vector<16x32xbf16>, vector<32x64xbf16>, vector<16x64xf32> -> vector<16x64xf32>
    %139 = vector.broadcast %8 : vector<1x64xf32> to vector<16x64xf32>
    %140 = arith.addf %138, %139 : vector<16x64xf32>
    %cst_39 = arith.constant 0.000000e+00 : f32
    %141 = vector.broadcast %cst_39 : f32 to vector<16x64xf32>
    %142 = arith.maximumf %140, %141 : vector<16x64xf32>
    %143 = arith.truncf %142 : vector<16x64xf32> to vector<16x64xbf16>
    %c0_40 = arith.constant 0 : index
    %c0_41 = arith.constant 0 : index
    %144 = vector.load %arg3[%c0_40, %c0_41] : memref<64x32xbf16, #tpu.memory_space<vmem>>, vector<64x32xbf16>
    %cst_42 = arith.constant dense<0.000000e+00> : vector<16x32xf32>
    %145 = tpu.matmul %143, %144, %cst_42 {dimension_numbers = #tpu.dot_dimension_numbers<[1], [0], [0], [1], [0, 0, 1, 1], [], []>} : vector<16x64xbf16>, vector<64x32xbf16>, vector<16x32xf32> -> vector<16x32xf32>
    %146 = vector.broadcast %9 : vector<1x32xf32> to vector<16x32xf32>
    %147 = arith.addf %145, %146 : vector<16x32xf32>
    %148 = arith.addf %136, %147 : vector<16x32xf32>
    %cst_43 = arith.constant dense<0.000000e+00> : vector<16xf32>
    %149 = vector.multi_reduction <add>, %148, %cst_43 [1] : vector<16x32xf32> to vector<16xf32>
    %150 = vector.shape_cast %149 : vector<16xf32> to vector<16x1xf32>
    %cst_44 = arith.constant 3.200000e+01 : f32
    %151 = vector.broadcast %cst_44 : f32 to vector<16x1xf32>
    %152 = arith.divf %150, %151 : vector<16x1xf32>
    %153 = vector.broadcast %152 : vector<16x1xf32> to vector<16x32xf32>
    %154 = arith.subf %148, %153 : vector<16x32xf32>
    %155 = arith.mulf %154, %154 : vector<16x32xf32>
    %cst_45 = arith.constant dense<0.000000e+00> : vector<16xf32>
    %156 = vector.multi_reduction <add>, %155, %cst_45 [1] : vector<16x32xf32> to vector<16xf32>
    %157 = vector.shape_cast %156 : vector<16xf32> to vector<16x1xf32>
    %cst_46 = arith.constant 3.200000e+01 : f32
    %158 = vector.broadcast %cst_46 : f32 to vector<16x1xf32>
    %159 = arith.divf %157, %158 : vector<16x1xf32>
    %160 = vector.broadcast %152 : vector<16x1xf32> to vector<16x32xf32>
    %161 = arith.subf %148, %160 : vector<16x32xf32>
    %cst_47 = arith.constant 9.99999997E-7 : f32
    %162 = vector.broadcast %cst_47 : f32 to vector<16x1xf32>
    %163 = arith.addf %159, %162 : vector<16x1xf32>
    %164 = math.rsqrt %163 : vector<16x1xf32>
    %165 = vector.broadcast %164 : vector<16x1xf32> to vector<16x32xf32>
    %166 = arith.mulf %161, %165 : vector<16x32xf32>
    %167 = vector.broadcast %10 : vector<1x32xf32> to vector<16x32xf32>
    %168 = arith.mulf %166, %167 : vector<16x32xf32>
    %169 = vector.broadcast %11 : vector<1x32xf32> to vector<16x32xf32>
    %170 = arith.addf %168, %169 : vector<16x32xf32>
    %c0_48 = arith.constant 0 : index
    %c0_49 = arith.constant 0 : index
    %171 = vector.load %arg5[%c0_48, %c0_49] : memref<16x32xf32, #tpu.memory_space<vmem>>, vector<16x32xf32>
    tpu.vector_store %arg5[%c0_48, %c0_49], %170 {strides = array<i32>} : memref<16x32xf32, #tpu.memory_space<vmem>>, vector<16x32xf32>,
    return
  }
  func.func @transform_0(%arg0: i32) -> (i32, i32) {
    %c0_i32 = arith.constant 0 : i32
    %c0_i32_0 = arith.constant 0 : i32
    return %arg0, %c0_i32 : i32, i32
  }
  func.func @transform_1(%arg0: i32) -> (i32, i32) {
    %c0_i32 = arith.constant 0 : i32
    %c0_i32_0 = arith.constant 0 : i32
    %c0_i32_1 = arith.constant 0 : i32
    return %c0_i32, %c0_i32_0 : i32, i32
  }
  func.func @transform_2(%arg0: i32) -> (i32, i32) {
    %c0_i32 = arith.constant 0 : i32
    %c0_i32_0 = arith.constant 0 : i32
    %c0_i32_1 = arith.constant 0 : i32
    return %c0_i32, %c0_i32_0 : i32, i32
  }
  func.func @transform_3(%arg0: i32) -> (i32, i32) {
    %c0_i32 = arith.constant 0 : i32
    %c0_i32_0 = arith.constant 0 : i32
    %c0_i32_1 = arith.constant 0 : i32
    return %c0_i32, %c0_i32_0 : i32, i32
  }
  func.func @transform_4(%arg0: i32) -> (i32, i32) {
    %c0_i32 = arith.constant 0 : i32
    %c0_i32_0 = arith.constant 0 : i32
    return %arg0, %c0_i32 : i32, i32
  }
}

</mosaic_0001>

<bundles_post_ra>
// kernel: tpu_custom_call.1
= control target key start
LH: loop header
LB: loop body
LE: loop exit
PB: predicated region body
PF: predicated region fallthrough
CT: control target
= control target key end

     0   :  { %9 = vsyncpa [#allocation3], 0  ;;  %s1244_s0 = inlined_call_operand.vmem [shape: f32[16,32], index: 0, kind: input, shape index: {}]   ;;  %s1245_s1 = inlined_call_operand.vmem [shape: bf16[32,192], index: 1, kind: input, shape index: {}]   ;;  %s1246_s2 = inlined_call_operand.vmem [shape: bf16[64,32], index: 2, kind: input, shape index: {}]   ;;  %s1247_s3 = inlined_call_operand.hbm [shape: f32[8,96], index: 3, kind: input, shape index: {}]   ;;  %s1248_s4 = inlined_call_operand.hbm [shape: f32[16,32], index: 4, kind: output, shape index: {}]  }
   0x1   :  { %10 = vsyncpa [#allocation4], 0  ;;  %s22_s17 = sshll.u32 %s1247_s3, 4  ;;  %s1015_s18 = smov [#allocation2]   ;;  %s23_s17 = int_to_ptr.hbm [resolvable:$true] %s22_s17 }
   0x2   :  { %s24_s19 = sshll.u32 %s1015_s18, 4  ;;  %s25_s19 = int_to_ptr.vmem [resolvable:$true] %s24_s19 }
   0x3   :  { %27 = dma.hbm_to_vmem [thread:$0]  %s23_s17, 128, %s25_s19, [#allocation3]  }
   0x4   :  { %1011 = dma.done.wait [#allocation3], 128  }
   0x5   :  { %1012 = vsyncadd [#allocation3], 4294967168  ;;  %v825_v0 = vld [vmem:[%s1245_s1 + $0x10] sm:$0xf]  ;;  %v872_v1 = vld [vmem:[%s1245_s1 + $0x14] sm:$0xf0] }
   0x6   :  { %v821_v2 = vld [vmem:[%s1245_s1] sm:$0xf]  ;;  %v1071_v3 = vor.u32 %v872_v1, %v825_v0  ;;  %v871_v4 = vld [vmem:[%s1245_s1 + $0x4] sm:$0xf0]  ;;  %vm65_vm0 = vcmask 261120   ;;  %s1017_s5 = smov 88  }
   0x7   :  { %v1079_v5 = vld [vmem:[%s1244_s0] sm:$0xff]  ;;  %v1084_v6 = vld [vmem:[%s1244_s0 + $0x8] sm:$0xff]  ;;  %v1087_v7 = vor.u32 %v871_v4, %v821_v2  ;;  %s1016_s0 = smov 120   ;;  %s1018_s6 = smov 96   ;;  %vm90_vm1 = vcmask 64512   ;;  %vm165_vm2 = vcmask 1043456  }
   0x8   :  { %75 = vmatpush.bf16.msra.mxu0 %v1071_v3  ;;  %v51_v8 = vpack.c.bf16 %v1084_v6, %v1079_v5  ;;  %v913_v9 = vld [vmem:[#allocation2] ss:$0 sm:$0xff]  ;;  %s1019_s7 = smov 112   ;;  %s1020_s8 = smov 80   ;;  %vm571_vm3 = vcmask 130048   ;;  %vm574_vm4 = vcmask 195584  }
   0x9   :  { %s1021_s9 = smov 72   ;;  %s1022_s10 = smov 104   ;;  %vm728_vm12 = vcmask 523264  }
   0xa   :  { %s1023_s11 = smov 64   ;;  %s1024_s12 = smov 56  }
   0xb   :  { %s1025_s13 = smov 48   ;;  %s1026_s14 = smov 40  }
   0xc   :  { %76 = vmatpush.bf16.msra.mxu0 %v1087_v7  ;;  %s1027_s15 = smov 32   ;;  %s1028_s16 = smov 8  }
   0xd   :  { %s1029_s17 = smov 16   ;;  %s1030_s18 = smov 24  }
   0xf   :  { %827 = vmatmul.msk.bf16.vlgmr.msra.gmra.mxu0 %vm65_vm0, %v51_v8 }
  0x8c   :  { %v78_v10 = vpop.f32.mrf.mxu0 }
  0x8d   :  { %v79_v11 = vadd.f32 %v913_v9, %v78_v10 }
  0x8f   :  { %v83_v12 = vpack.c.bf16 %v79_v11, %v79_v11 }
  0x91   :  { %v86_v13 = vunpack.c.l.b16 %v83_v12 }
  0x93   :  { %v1093_v14 = vpack.c.b16 %v86_v13, %v86_v13 }
  0x94   :  { %v80_v15 = vpop.f32.mrf.mxu0 }
  0x95   :  { %v81_v16 = vadd.f32 %v913_v9, %v80_v15  ;;  %203 = vrot.lane.b32.xlu2 %v1093_v14, %s1016_s0  ;;  %205 = vrot.lane.b32.xlu1 %v1093_v14, %s1017_s5 }
  0x96   :  { %88 = vrot.lane.b32.xlu0 %v1093_v14, %s1018_s6 }
  0x97   :  { %v84_v17 = vpack.c.bf16 %v81_v16, %v81_v16 }
  0x99   :  { %v111_v18 = vunpack.c.l.b16 %v84_v17 }
  0x9b   :  { %v1098_v19 = vpack.c.b16 %v111_v18, %v111_v18 }
  0x9d   :  { %226 = vrot.lane.b32.xlu2 %v1098_v19, %s1016_s0  ;;  %228 = vrot.lane.b32.xlu1 %v1098_v19, %s1017_s5 }
  0x9e   :  { %113 = vrot.lane.b32.xlu0 %v1098_v19, %s1018_s6 }
  0xa5   :  { %317 = vrot.lane.b32.xlu2 %v1093_v14, %s1019_s7  ;;  %342 = vrot.lane.b32.xlu1 %v1098_v19, %s1020_s8 }
  0xa6   :  { %319 = vrot.lane.b32.xlu0 %v1093_v14, %s1020_s8 }
  0xad   :  { %456 = vrot.lane.b32.xlu2 %v1098_v19, %s1021_s9  ;;  %433 = vrot.lane.b32.xlu1 %v1093_v14, %s1021_s9  ;;  %s806_s9 = sshll.u32 %s1248_s4, 4  ;;  %s807_s9 = int_to_ptr.hbm [resolvable:$true] %s806_s9 }
  0xae   :  { %340 = vrot.lane.b32.xlu0 %v1098_v19, %s1019_s7 }
  0xb5   :  { %454 = vrot.lane.b32.xlu1 %v1098_v19, %s1022_s10 }
  0xb6   :  { %431 = vrot.lane.b32.xlu0 %v1093_v14, %s1022_s10  ;;  %s1033_s10 = smov 128  }
  0xef   :  { %v204_v20 = vpop.permute.xlu2 %203 }
  0xf7   :  { %v227_v25 = vpop.permute.xlu2 %226 }
  0xff   :  { %v318_v30 = vpop.permute.xlu2 %317 }
 0x107   :  { %v206_v21 = vpop.permute.xlu1 %205  ;;  %v457_v35 = vpop.permute.xlu2 %456 }
 0x108   :  { %v89_v22 = vpop.permute.xlu0 %88  ;;  %v211_v23 = vsel %vm90_vm1, %v206_v21, 0  ;;  %v462_v38 = vsel %vm90_vm1, %v457_v35, 0 }
 0x109   :  { %v95_v24 = vsel %vm90_vm1, %v89_v22, 0  ;;  %220 = vmatpush.bf16.xpose.msrb.mxu0 %v211_v23 }
 0x10a   :  { %104 = vmatpush.bf16.xpose.msra.mxu1 %v95_v24 }
 0x10f   :  { %v229_v26 = vpop.permute.xlu1 %228 }
 0x110   :  { %v114_v27 = vpop.permute.xlu0 %113  ;;  %832 = vmatmul.msk.bf16.vlgmr.msrb.gmra.mxu0 %vm90_vm1, %v204_v20  ;;  %v234_v28 = vsel %vm90_vm1, %v229_v26, 0 }
 0x111   :  { %828 = vmatmul.msk.bf16.vlgmr.msra.gmra.mxu1 %vm90_vm1, %v83_v12  ;;  %v119_v29 = vsel %vm90_vm1, %v114_v27, 0 }
 0x112   :  { %128 = vmatpush.bf16.xpose.msra.mxu2 %v119_v29  ;;  %243 = vmatpush.bf16.xpose.msrb.mxu1 %v234_v28 }
 0x117   :  { %v343_v31 = vpop.permute.xlu1 %342 }
 0x118   :  { %v348_v32 = vsel %vm90_vm1, %v343_v31, 0  ;;  %v320_v33 = vpop.permute.xlu0 %319 }
 0x119   :  { %v325_v34 = vsel %vm90_vm1, %v320_v33, 0  ;;  %829 = vmatmul.msk.bf16.vlgmr.msra.gmra.mxu2 %vm90_vm1, %v84_v17 }
 0x11a   :  { %357 = vmatpush.bf16.xpose.msra.mxu1 %v348_v32  ;;  %334 = vmatpush.bf16.xpose.msra.mxu0 %v325_v34 }
 0x11f   :  { %v434_v36 = vpop.permute.xlu1 %433 }
 0x120   :  { %v439_v37 = vsel %vm90_vm1, %v434_v36, 0  ;;  %v341_v39 = vpop.permute.xlu0 %340 }
 0x121   :  { %833 = vmatmul.msk.bf16.vlgmr.msrb.gmra.mxu1 %vm90_vm1, %v227_v25  ;;  %836 = vmatmul.msk.bf16.vlgmr.msra.gmra.mxu0 %vm90_vm1, %v318_v30 }
 0x122   :  { %471 = vmatpush.bf16.xpose.msrb.mxu1 %v462_v38  ;;  %448 = vmatpush.bf16.xpose.msrb.mxu0 %v439_v37 }
 0x127   :  { %v455_v41 = vpop.permute.xlu1 %454 }
 0x128   :  { %v432_v40 = vpop.permute.xlu0 %431 }
 0x131   :  { %837 = vmatmul.msk.bf16.vlgmr.msra.gmra.mxu1 %vm90_vm1, %v341_v39  ;;  %840 = vmatmul.msk.bf16.vlgmr.msrb.gmra.mxu0 %vm90_vm1, %v432_v40 }
 0x141   :  { %841 = vmatmul.msk.bf16.vlgmr.msrb.gmra.mxu1 %vm90_vm1, %v455_v41 }
 0x18d   :  { %v222_v42 = vpop.f32.mrf.mxu0 }
 0x18e   :  { %v106_v43 = vpop.f32.mrf.mxu1  ;;  %v249_v44 = vmul.f32 0.35355338, %v222_v42 }
 0x18f   :  { %v134_v45 = vmul.f32 0.35355338, %v106_v43 }
 0x190   :  { %v251_v46 = vsel %vm90_vm1, %v249_v44, -inf }
 0x191   :  { %252 = vmax.xlane.f32.xlu1 %v251_v46  ;;  %v136_v47 = vsel %vm90_vm1, %v134_v45, -inf }
 0x192   :  { %137 = vmax.xlane.f32.xlu2 %v136_v47 }
 0x195   :  { %v224_v48 = vpop.f32.mrf.mxu0 }
 0x196   :  { %v108_v49 = vpop.f32.mrf.mxu1 }
 0x19c   :  { %v130_v50 = vpop.f32.mrf.mxu2 }
 0x19d   :  { %v135_v51 = vmul.f32 0.35355338, %v130_v50 }
 0x19e   :  { %v245_v52 = vpop.f32.mrf.mxu1  ;;  %v336_v53 = vpop.f32.mrf.mxu0 }
 0x19f   :  { %v250_v54 = vmul.f32 0.35355338, %v245_v52  ;;  %v139_v55 = vsel %vm90_vm1, %v135_v51, -inf  ;;  %v363_v10 = vmul.f32 0.35355338, %v336_v53 }
 0x1a0   :  { %140 = vmax.xlane.f32.xlu0 %v139_v55 }
 0x1a1   :  { %v254_v56 = vsel %vm90_vm1, %v250_v54, -inf  ;;  %v365_v12 = vsel %vm90_vm1, %v363_v10, -inf }
 0x1a2   :  { %255 = vmax.xlane.f32.xlu2 %v254_v56 }
 0x1a4   :  { %v132_v57 = vpop.f32.mrf.mxu2 }
 0x1a6   :  { %v247_v58 = vpop.f32.mrf.mxu1  ;;  %v338_v59 = vpop.f32.mrf.mxu0 }
 0x1aa   :  { %182 = vrot.lane.b32.xlu1 %v1098_v19, %s1023_s11 }
 0x1ae   :  { %v359_v60 = vpop.f32.mrf.mxu1  ;;  %v450_v61 = vpop.f32.mrf.mxu0 }
 0x1af   :  { %v364_v4 = vmul.f32 0.35355338, %v359_v60  ;;  %v477_v11 = vmul.f32 0.35355338, %v450_v61 }
 0x1b1   :  { %v368_v9 = vsel %vm90_vm1, %v364_v4, -inf  ;;  %v479_v13 = vsel %vm90_vm1, %v477_v11, -inf }
 0x1b2   :  { %296 = vrot.lane.b32.xlu1 %v1098_v19, %s1024_s12 }
 0x1b4   :  { %275 = vrot.lane.b32.xlu0 %v1093_v14, %s1024_s12 }
 0x1b6   :  { %v361_v62 = vpop.f32.mrf.mxu1  ;;  %v452_v63 = vpop.f32.mrf.mxu0 }
 0x1ba   :  { %160 = vrot.lane.b32.xlu2 %v1093_v14, %s1023_s11 }
 0x1be   :  { %v473_v0 = vpop.f32.mrf.mxu1 }
 0x1bf   :  { %v478_v2 = vmul.f32 0.35355338, %v473_v0 }
 0x1c1   :  { %v482_v8 = vsel %vm90_vm1, %v478_v2, -inf }
 0x1c6   :  { %v475_v1 = vpop.f32.mrf.mxu1 }
 0x1dc   :  { %483 = vmax.xlane.f32.xlu1 %v482_v8 }
 0x1de   :  { %369 = vmax.xlane.f32.xlu0 %v368_v9 }
 0x1e3   :  { %366 = vmax.xlane.f32.xlu2 %v365_v12 }
 0x1e6   :  { %480 = vmax.xlane.f32.xlu0 %v479_v13 }
 0x204   :  { %v253_v15 = vpop.xlane.xlu1 %252 }
 0x205   :  { %v257_v16 = vsub.f32 %v249_v44, %v253_v15  ;;  %v138_v17 = vpop.xlane.xlu2 %137 }
 0x206   :  { %v142_v18 = vsub.f32 %v134_v45, %v138_v17 }
 0x207   :  { %v259_v20 = vmul.f32 1.442695, %v257_v16 }
 0x208   :  { %v144_v21 = vmul.f32 1.442695, %v142_v18 }
 0x209   :  { %921 = vpow2.f32 %v259_v20 }
 0x20a   :  { %923 = vpow2.f32 %v144_v21 }
 0x20f   :  { %v1139_v22 = vpop.eup %921 }
 0x210   :  { %v1141_v23 = vpop.eup %923  ;;  %v263_v24 = vsel %vm90_vm1, %v1139_v22, 0.0 }
 0x211   :  { %v148_v25 = vsel %vm90_vm1, %v1141_v23, 0.0  ;;  %264 = vadd.xlane.f32.xlu0 %v263_v24 }
 0x212   :  { %149 = vadd.xlane.f32.xlu1 %v148_v25 }
 0x213   :  { %v141_v26 = vpop.xlane.xlu0 %140 }
 0x214   :  { %v143_v27 = vsub.f32 %v135_v51, %v141_v26 }
 0x215   :  { %v256_v28 = vpop.xlane.xlu2 %255 }
 0x216   :  { %v146_v29 = vmul.f32 1.442695, %v143_v27  ;;  %v258_v30 = vsub.f32 %v250_v54, %v256_v28 }
 0x218   :  { %925 = vpow2.f32 %v146_v29  ;;  %v261_v31 = vmul.f32 1.442695, %v258_v30 }
 0x21a   :  { %927 = vpow2.f32 %v261_v31 }
 0x21c   :  { %v183_v32 = vpop.permute.xlu1 %182 }
 0x21d   :  { %v161_v33 = vpop.permute.xlu2 %160  ;;  %v188_v34 = vsel %vm165_vm2, %v183_v32, 0 }
 0x21e   :  { %v1148_v35 = vpop.eup %925  ;;  %v167_v36 = vsel %vm165_vm2, %v161_v33, 0 }
 0x21f   :  { %176 = vmatpush.bf16.msra.mxu3 %v167_v36  ;;  %v151_v37 = vsel %vm90_vm1, %v1148_v35, 0.0 }
 0x220   :  { %v1153_v38 = vpop.eup %927  ;;  %152 = vadd.xlane.f32.xlu0 %v151_v37 }
 0x221   :  { %v266_v39 = vsel %vm90_vm1, %v1153_v38, 0.0 }
 0x222   :  { %267 = vadd.xlane.f32.xlu2 %v266_v39 }
 0x223   :  { %197 = vmatpush.bf16.msrb.mxu3 %v188_v34 }
 0x224   :  { %v297_v42 = vpop.permute.xlu1 %296 }
 0x226   :  { %v276_v40 = vpop.permute.xlu0 %275 }
 0x227   :  { %v281_v41 = vsel %vm165_vm2, %v276_v40, 0 }
 0x228   :  { %290 = vmatpush.bf16.msrb.mxu2 %v281_v41 }
 0x22b   :  { %410 = vrot.lane.b32.xlu1 %v1098_v19, %s1025_s13 }
 0x23a   :  { %389 = vrot.lane.b32.xlu2 %v1093_v14, %s1025_s13 }
 0x24f   :  { %v484_v43 = vpop.xlane.xlu1 %483 }
 0x250   :  { %v486_v44 = vsub.f32 %v478_v2, %v484_v43 }
 0x251   :  { %v370_v45 = vpop.xlane.xlu0 %369 }
 0x252   :  { %v372_v46 = vsub.f32 %v364_v4, %v370_v45  ;;  %v489_v48 = vmul.f32 1.442695, %v486_v44 }
 0x254   :  { %v375_v47 = vmul.f32 1.442695, %v372_v46 }
 0x256   :  { %929 = vpow2.f32 %v375_v47  ;;  %v367_v49 = vpop.xlane.xlu2 %366 }
 0x257   :  { %v371_v50 = vsub.f32 %v363_v10, %v367_v49  ;;  %931 = vpow2.f32 %v489_v48 }
 0x259   :  { %v373_v51 = vmul.f32 1.442695, %v371_v50  ;;  %v481_v52 = vpop.xlane.xlu0 %480 }
 0x25a   :  { %v485_v53 = vsub.f32 %v477_v11, %v481_v52  ;;  %v302_v11 = vsel %vm165_vm2, %v297_v42, 0 }
 0x25b   :  { %933 = vpow2.f32 %v373_v51 }
 0x25c   :  { %v930_v54 = vpop.eup %929  ;;  %v487_v55 = vmul.f32 1.442695, %v485_v53 }
 0x25d   :  { %v380_v56 = vsel %vm90_vm1, %v930_v54, 0.0  ;;  %v1161_v57 = vpop.eup %931 }
 0x25e   :  { %935 = vpow2.f32 %v487_v55  ;;  %381 = vadd.xlane.f32.xlu0 %v380_v56  ;;  %v494_v60 = vsel %vm90_vm1, %v1161_v57, 0.0 }
 0x261   :  { %v934_v58 = vpop.eup %933 }
 0x262   :  { %v377_v59 = vsel %vm90_vm1, %v934_v58, 0.0 }
 0x263   :  { %378 = vadd.xlane.f32.xlu1 %v377_v59  ;;  %495 = vadd.xlane.f32.xlu2 %v494_v60 }
 0x264   :  { %v936_v61 = vpop.eup %935 }
 0x265   :  { %v491_v62 = vsel %vm90_vm1, %v936_v61, 0.0 }
 0x266   :  { %492 = vadd.xlane.f32.xlu0 %v491_v62 }
 0x27a   :  { %503 = vrot.lane.b32.xlu0 %v1093_v14, %s1026_s14 }
 0x27b   :  { %579 = vrot.lane.b32.xlu2 %v1087_v7, %s1027_s15 }
 0x27c   :  { %524 = vrot.lane.b32.xlu1 %v1098_v19, %s1026_s14 }
 0x282   :  { %581 = vrot.lane.b32.xlu0 %v1071_v3, %s1027_s15 }
 0x284   :  { %v265_v63 = vpop.xlane.xlu0 %264 }
 0x285   :  { %v150_v0 = vpop.xlane.xlu1 %149  ;;  %937 = vrcp.f32 %v265_v63 }
 0x286   :  { %939 = vrcp.f32 %v150_v0 }
 0x28b   :  { %v938_v1 = vpop.eup %937 }
 0x28c   :  { %v940_v2 = vpop.eup %939  ;;  %v271_v4 = vmul.f32 %v938_v1, %v1139_v22 }
 0x28d   :  { %v156_v8 = vmul.f32 %v940_v2, %v1141_v23 }
 0x28e   :  { %v273_v9 = vpack.c.bf16 %v271_v4, %v271_v4 }
 0x28f   :  { %v158_v10 = vpack.c.bf16 %v156_v8, %v156_v8 }
 0x290   :  { %834 = vmatmul.msk.bf16.vlgmr.msrb.gmra.mxu2 %vm90_vm1, %v273_v9 }
 0x291   :  { %830 = vmatmul.msk.bf16.vlgmr.msra.gmra.mxu3 %vm90_vm1, %v158_v10 }
 0x292   :  { %311 = vmatpush.bf16.msra.mxu3 %v302_v11 }
 0x293   :  { %v153_v14 = vpop.xlane.xlu0 %152 }
 0x294   :  { %941 = vrcp.f32 %v153_v14 }
 0x295   :  { %v268_v19 = vpop.xlane.xlu2 %267 }
 0x296   :  { %943 = vrcp.f32 %v268_v19 }
 0x29a   :  { %v942_v12 = vpop.eup %941 }
 0x29b   :  { %v157_v13 = vmul.f32 %v942_v12, %v1148_v35 }
 0x29c   :  { %v944_v21 = vpop.eup %943 }
 0x29d   :  { %v390_v15 = vpop.permute.xlu2 %389  ;;  %v411_v17 = vpop.permute.xlu1 %410  ;;  %v159_v18 = vpack.c.bf16 %v157_v13, %v157_v13  ;;  %v272_v22 = vmul.f32 %v944_v21, %v1153_v38 }
 0x29e   :  { %v395_v16 = vsel %vm165_vm2, %v390_v15, 0  ;;  %v416_v20 = vsel %vm165_vm2, %v411_v17, 0 }
 0x29f   :  { %404 = vmatpush.bf16.msra.mxu2 %v395_v16  ;;  %v274_v23 = vpack.c.bf16 %v272_v22, %v272_v22 }
 0x2a1   :  { %831 = vmatmul.msk.bf16.vlgmr.msrb.gmra.mxu3 %vm90_vm1, %v159_v18  ;;  %v914_v18 = vld [vmem:[#allocation2 + $0x1] ss:$0 sm:$0xff] }
 0x2a2   :  { %425 = vmatpush.bf16.msrb.mxu3 %v416_v20 }
 0x2b1   :  { %835 = vmatmul.msk.bf16.vlgmr.msra.gmra.mxu3 %vm90_vm1, %v274_v23 }
 0x2d1   :  { %v382_v24 = vpop.xlane.xlu0 %381 }
 0x2d2   :  { %945 = vrcp.f32 %v382_v24 }
 0x2d6   :  { %v379_v25 = vpop.xlane.xlu1 %378  ;;  %v496_v31 = vpop.xlane.xlu2 %495 }
 0x2d7   :  { %947 = vrcp.f32 %v379_v25 }
 0x2d8   :  { %v946_v26 = vpop.eup %945  ;;  %949 = vrcp.f32 %v496_v31 }
 0x2d9   :  { %v386_v27 = vmul.f32 %v946_v26, %v930_v54  ;;  %v493_v33 = vpop.xlane.xlu0 %492 }
 0x2da   :  { %951 = vrcp.f32 %v493_v33 }
 0x2db   :  { %v388_v28 = vpack.c.bf16 %v386_v27, %v386_v27 }
 0x2dd   :  { %839 = vmatmul.msk.bf16.vlgmr.msrb.gmra.mxu3 %vm90_vm1, %v388_v28  ;;  %v948_v29 = vpop.eup %947  ;;  %v1031_v28 = vmov 32.0  }
 0x2de   :  { %v385_v30 = vmul.f32 %v948_v29, %v934_v58  ;;  %v950_v3 = vpop.eup %949  ;;  %v580_v62 = vpop.permute.xlu2 %579  ;;  %953 = vrcp.f32 %v1031_v28  ;;  %v918_v28 = vld [vmem:[#allocation2 + $0x5] ss:$0 sm:$0xff] }
 0x2df   :  { %v500_v35 = vmul.f32 %v950_v3, %v1161_v57 }
 0x2e0   :  { %v387_v32 = vpack.c.bf16 %v385_v30, %v385_v30  ;;  %v952_v7 = vpop.eup %951 }
 0x2e1   :  { %v499_v36 = vmul.f32 %v952_v7, %v936_v61  ;;  %v502_v40 = vpack.c.bf16 %v500_v35, %v500_v35 }
 0x2e2   :  { %838 = vmatmul.msk.bf16.vlgmr.msra.gmra.mxu2 %vm90_vm1, %v387_v32 }
 0x2e3   :  { %v501_v41 = vpack.c.bf16 %v499_v36, %v499_v36 }
 0x2e4   :  { %v954_v29 = vpop.eup %953 }
 0x2e5   :  { %v611_v30 = vmul.f32 32.0, %v954_v29  ;;  %vm615_vm5 = vweird.f32 %v954_v29 }
 0x2e7   :  { %v612_v31 = vsub.f32 1.0, %v611_v30 }
 0x2e9   :  { %v613_v32 = vmul.f32 %v954_v29, %v612_v31 }
 0x2eb   :  { %v614_v33 = vadd.f32 %v954_v29, %v613_v32 }
 0x2ec   :  { %v504_v34 = vpop.permute.xlu0 %503 }
 0x2ed   :  { %v509_v37 = vsel %vm165_vm2, %v504_v34, 0  ;;  %v1197_v3 = vsel %vm615_vm5, %v954_v29, %v614_v33 }
 0x2ee   :  { %v525_v38 = vpop.permute.xlu1 %524  ;;  %518 = vmatpush.bf16.msrb.mxu2 %v509_v37 }
 0x2ef   :  { %v530_v39 = vsel %vm165_vm2, %v525_v38, 0 }
 0x2f0   :  { %539 = vmatpush.bf16.msra.mxu3 %v530_v39 }
 0x2f2   :  { %842 = vmatmul.msk.bf16.vlgmr.msrb.gmra.mxu2 %vm90_vm1, %v501_v41  ;;  %v851_v41 = vld [vmem:[%s1245_s1 + $0x14] sm:$0xf] }
 0x2f3   :  { %843 = vmatmul.msk.bf16.vlgmr.msra.gmra.mxu3 %vm90_vm1, %v502_v40 }
 0x2f4   :  { %v582_v61 = vpop.permute.xlu0 %581 }
 0x2f5   :  { %594 = vmatpush.bf16.msra.mxu0 %v582_v61 }
 0x2f9   :  { %595 = vmatpush.bf16.msra.mxu0 %v580_v62 }
 0x313   :  { %v292_v42 = vpop.f32.mrf.mxu2 }
 0x314   :  { %v178_v43 = vpop.f32.mrf.mxu3 }
 0x31b   :  { %v294_v44 = vpop.f32.mrf.mxu2 }
 0x31c   :  { %v180_v45 = vpop.f32.mrf.mxu3 }
 0x324   :  { %v199_v46 = vpop.f32.mrf.mxu3 }
 0x32c   :  { %v201_v47 = vpop.f32.mrf.mxu3 }
 0x32d   :  { %v873_v47 = vld [vmem:[%s1245_s1 + $0x8] sm:$0xf0] }
 0x334   :  { %v313_v48 = vpop.f32.mrf.mxu3 }
 0x335   :  { %v898_v49 = vpack.i.bf16 %v313_v48, %v292_v42  ;;  %v874_v42 = vld [vmem:[%s1245_s1 + $0x18] sm:$0xf0] }
 0x337   :  { %899 = vrot.lane.b32.xlu1 %v898_v49, %s1028_s16 }
 0x33c   :  { %v315_v50 = vpop.f32.mrf.mxu3 }
 0x360   :  { %v427_v51 = vpop.f32.mrf.mxu3 }
 0x365   :  { %v406_v52 = vpop.f32.mrf.mxu2 }
 0x366   :  { %v903_v53 = vpack.i.bf16 %v427_v51, %v406_v52 }
 0x368   :  { %v429_v54 = vpop.f32.mrf.mxu3  ;;  %904 = vrot.lane.b32.xlu0 %v903_v53, %s1029_s17 }
 0x36d   :  { %v408_v55 = vpop.f32.mrf.mxu2 }
 0x375   :  { %v520_v56 = vpop.f32.mrf.mxu2 }
 0x376   :  { %v541_v57 = vpop.f32.mrf.mxu3 }
 0x377   :  { %v908_v58 = vpack.i.bf16 %v541_v57, %v520_v56 }
 0x379   :  { %909 = vrot.lane.b32.xlu1 %v908_v58, %s1030_s18 }
 0x37d   :  { %v522_v59 = vpop.f32.mrf.mxu2 }
 0x37e   :  { %v543_v60 = vpop.f32.mrf.mxu3 }
 0x3a9   :  { %v900_v63 = vpop.permute.xlu1 %899 }
 0x3aa   :  { %v902_v1 = vunpack.i.h.bf16 %v900_v63  ;;  %v901_v2 = vunpack.i.l.bf16 %v900_v63 }
 0x3ac   :  { %v570_v10 = vsel %vm90_vm1, %v199_v46, %v902_v1  ;;  %v569_v11 = vsel %vm90_vm1, %v178_v43, %v901_v2  ;;  %v852_v43 = vor.u32 %v874_v42, %v851_v41  ;;  %v847_v46 = vld [vmem:[%s1245_s1 + $0x4] sm:$0xf]  ;;  %v915_v1 = vld [vmem:[#allocation2 + $0x2] ss:$0 sm:$0xff] }
 0x3ad   :  { %v848_v49 = vor.u32 %v873_v47, %v847_v46 }
 0x3ae   :  { %684 = vmatpush.bf16.msra.mxu1 %v852_v43 }
 0x3b2   :  { %685 = vmatpush.bf16.msra.mxu1 %v848_v49 }
 0x3da   :  { %v905_v0 = vpop.permute.xlu0 %904 }
 0x3db   :  { %v907_v4 = vunpack.i.h.bf16 %v905_v0  ;;  %v906_v8 = vunpack.i.l.bf16 %v905_v0 }
 0x3dd   :  { %v573_v12 = vsel %vm571_vm3, %v570_v10, %v907_v4  ;;  %v572_v13 = vsel %vm571_vm3, %v569_v11, %v906_v8 }
 0x3eb   :  { %v910_v9 = vpop.permute.xlu1 %909 }
 0x3ec   :  { %v912_v14 = vunpack.i.h.bf16 %v910_v9  ;;  %v911_v19 = vunpack.i.l.bf16 %v910_v9  ;;  %v916_v9 = vld [vmem:[#allocation2 + $0x3] ss:$0 sm:$0xff] }
 0x3ee   :  { %v575_v15 = vsel %vm574_vm4, %v572_v13, %v911_v19  ;;  %v576_v16 = vsel %vm574_vm4, %v573_v12, %v912_v14 }
 0x3ef   :  { %v577_v17 = vpack.c.bf16 %v576_v16, %v575_v15  ;;  %v878_v15 = vld [vmem:[%s1246_s2 + $0x18] sm:$0xff]  ;;  %v877_v16 = vld [vmem:[%s1246_s2 + $0x10] sm:$0xff] }
 0x3f0   :  { %736 = vmatpush.bf16.msra.mxu2 %v878_v15 }
 0x3f1   :  { %844 = vmatmul.msk.bf16.vlgmr.msra.gmra.mxu0 %vm65_vm0, %v577_v17  ;;  %v876_v17 = vld [vmem:[%s1246_s2 + $0x8] sm:$0xff] }
 0x3f4   :  { %737 = vmatpush.bf16.msra.mxu2 %v877_v16 }
 0x3f8   :  { %738 = vmatpush.bf16.msra.mxu2 %v876_v17 }
 0x46e   :  { %v597_v20 = vpop.f32.mrf.mxu0 }
 0x46f   :  { %v598_v21 = vadd.f32 %v914_v18, %v597_v20 }
 0x471   :  { %v602_v22 = vadd.f32 %v598_v21, %v1079_v5  ;;  %v917_v21 = vld [vmem:[#allocation2 + $0x4] ss:$0 sm:$0xff] }
 0x473   :  { %v604_v23 = vsel %vm65_vm0, %v602_v22, 0.0 }
 0x474   :  { %605 = vadd.xlane.f32.xlu0 %v604_v23 }
 0x476   :  { %v599_v24 = vpop.f32.mrf.mxu0 }
 0x477   :  { %v600_v25 = vadd.f32 %v914_v18, %v599_v24  ;;  %v875_v18 = vld [vmem:[%s1246_s2] sm:$0xff]  ;;  %s1032_s2 = smov [#allocation5]  }
 0x478   :  { %739 = vmatpush.bf16.msra.mxu2 %v875_v18  ;;  %s804_s6 = sshll.u32 %s1032_s2, 4  ;;  %s805_s6 = int_to_ptr.vmem [resolvable:$true] %s804_s6 }
 0x479   :  { %v603_v26 = vadd.f32 %v600_v25, %v1084_v6 }
 0x47b   :  { %v607_v27 = vsel %vm65_vm0, %v603_v26, 0.0 }
 0x47c   :  { %608 = vadd.xlane.f32.xlu1 %v607_v27 }
 0x4e7   :  { %v606_v5 = vpop.xlane.xlu0 %605 }
 0x4e8   :  { %v617_v7 = vmul.f32 %v1197_v3, %v606_v5 }
 0x4ea   :  { %v619_v34 = vsub.f32 %v602_v22, %v617_v7 }
 0x4ec   :  { %v621_v35 = vmul.f32 %v619_v34, %v619_v34 }
 0x4ee   :  { %v623_v6 = vsel %vm65_vm0, %v621_v35, 0.0 }
 0x4ef   :  { %v609_v36 = vpop.xlane.xlu1 %608  ;;  %624 = vadd.xlane.f32.xlu2 %v623_v6 }
 0x4f0   :  { %v618_v37 = vmul.f32 %v1197_v3, %v609_v36 }
 0x4f2   :  { %v620_v38 = vsub.f32 %v603_v26, %v618_v37 }
 0x4f4   :  { %v622_v39 = vmul.f32 %v620_v38, %v620_v38 }
 0x4f6   :  { %v626_v40 = vsel %vm65_vm0, %v622_v39, 0.0 }
 0x4f7   :  { %627 = vadd.xlane.f32.xlu0 %v626_v40 }
 0x562   :  { %v625_v44 = vpop.xlane.xlu2 %624 }
 0x563   :  { %v629_v45 = vmul.f32 %v625_v44, %v1197_v3 }
 0x565   :  { %v631_v48 = vadd.f32 1e-06, %v629_v45 }
 0x567   :  { %955 = vrsqrt.f32 %v631_v48  ;;  %vm639_vm7 = vweird.f32 %v631_v48 }
 0x56a   :  { %v628_v50 = vpop.xlane.xlu0 %627 }
 0x56b   :  { %v630_v51 = vmul.f32 %v628_v50, %v1197_v3 }
 0x56d   :  { %v956_v52 = vpop.eup %955  ;;  %v632_v53 = vadd.f32 1e-06, %v630_v51 }
 0x56e   :  { %v634_v54 = vmul.f32 %v956_v52, %v631_v48  ;;  %vm640_vm6 = vweird.f32 %v956_v52 }
 0x56f   :  { %957 = vrsqrt.f32 %v632_v53  ;;  %vm641_vm8 = vmor %vm639_vm7, %vm640_vm6  ;;  %vm649_vm10 = vweird.f32 %v632_v53 }
 0x570   :  { %v635_v55 = vmul.f32 %v956_v52, %v634_v54 }
 0x572   :  { %v636_v56 = vmul.f32 0.5, %v635_v55 }
 0x574   :  { %v637_v57 = vsub.f32 1.5, %v636_v56 }
 0x575   :  { %v958_v58 = vpop.eup %957 }
 0x576   :  { %v638_v59 = vmul.f32 %v956_v52, %v637_v57  ;;  %v644_v60 = vmul.f32 %v958_v58, %v632_v53  ;;  %vm650_vm9 = vweird.f32 %v958_v58 }
 0x577   :  { %vm651_vm11 = vmor %vm649_vm10, %vm650_vm9 }
 0x578   :  { %v645_v61 = vmul.f32 %v958_v58, %v644_v60  ;;  %v642_v62 = vsel %vm641_vm8, %v956_v52, %v638_v59 }
 0x579   :  { %v653_v2 = vmul.f32 %v642_v62, %v619_v34 }
 0x57a   :  { %v646_v63 = vmul.f32 0.5, %v645_v61  ;;  %v920_v61 = vld [vmem:[#allocation2 + $0x7] ss:$0 sm:$0xff] }
 0x57b   :  { %v656_v10 = vmul.f32 %v915_v1, %v653_v2 }
 0x57c   :  { %v647_v0 = vsub.f32 1.5, %v646_v63 }
 0x57d   :  { %v659_v19 = vadd.f32 %v916_v9, %v656_v10 }
 0x57e   :  { %v648_v4 = vmul.f32 %v958_v58, %v647_v0 }
 0x580   :  { %v652_v8 = vsel %vm651_vm11, %v958_v58, %v648_v4  ;;  %v919_v58 = vld [vmem:[#allocation2 + $0x6] ss:$0 sm:$0xff] }
 0x581   :  { %v654_v11 = vmul.f32 %v652_v8, %v620_v38 }
 0x583   :  { %v657_v14 = vmul.f32 %v915_v1, %v654_v11 }
 0x585   :  { %v660_v12 = vadd.f32 %v916_v9, %v657_v14 }
 0x587   :  { %v661_v13 = vpack.c.bf16 %v660_v12, %v659_v19 }
 0x589   :  { %853 = vmatmul.msk.bf16.vlgmr.msra.gmra.mxu1 %vm65_vm0, %v661_v13 }
 0x606   :  { %v687_v20 = vpop.f32.mrf.mxu1 }
 0x607   :  { %v688_v22 = vadd.f32 %v917_v21, %v687_v20 }
 0x609   :  { %v692_v25 = vmax.f32 %v688_v22, 0.0 }
 0x60e   :  { %v689_v23 = vpop.f32.mrf.mxu1 }
 0x60f   :  { %v690_v24 = vadd.f32 %v917_v21, %v689_v23 }
 0x611   :  { %v693_v26 = vmax.f32 %v690_v24, 0.0 }
 0x613   :  { %v694_v27 = vpack.c.bf16 %v693_v26, %v692_v25 }
 0x615   :  { %870 = vmatmul.msk.bf16.vlgmr.msra.gmra.mxu2 %vm728_vm12, %v694_v27 }
 0x698   :  { %v741_v29 = vpop.f32.mrf.mxu2 }
 0x699   :  { %v742_v30 = vadd.f32 %v918_v28, %v741_v29 }
 0x69b   :  { %v746_v31 = vadd.f32 %v742_v30, %v659_v19 }
 0x69d   :  { %v748_v32 = vsel %vm65_vm0, %v746_v31, 0.0 }
 0x69e   :  { %749 = vadd.xlane.f32.xlu1 %v748_v32 }
 0x6a0   :  { %v743_v33 = vpop.f32.mrf.mxu2 }
 0x6a1   :  { %v744_v5 = vadd.f32 %v918_v28, %v743_v33 }
 0x6a3   :  { %v747_v7 = vadd.f32 %v744_v5, %v660_v12 }
 0x6a5   :  { %v751_v34 = vsel %vm65_vm0, %v747_v7, 0.0 }
 0x6a6   :  { %752 = vadd.xlane.f32.xlu0 %v751_v34 }
 0x711   :  { %v750_v35 = vpop.xlane.xlu1 %749 }
 0x712   :  { %v754_v6 = vmul.f32 %v750_v35, %v1197_v3 }
 0x714   :  { %v756_v36 = vsub.f32 %v746_v31, %v754_v6 }
 0x716   :  { %v758_v37 = vmul.f32 %v756_v36, %v756_v36 }
 0x718   :  { %v760_v38 = vsel %vm65_vm0, %v758_v37, 0.0 }
 0x719   :  { %v753_v39 = vpop.xlane.xlu0 %752  ;;  %761 = vadd.xlane.f32.xlu1 %v760_v38 }
 0x71a   :  { %v755_v40 = vmul.f32 %v753_v39, %v1197_v3 }
 0x71c   :  { %v757_v41 = vsub.f32 %v747_v7, %v755_v40 }
 0x71e   :  { %v759_v42 = vmul.f32 %v757_v41, %v757_v41 }
 0x720   :  { %v763_v43 = vsel %vm65_vm0, %v759_v42, 0.0 }
 0x721   :  { %764 = vadd.xlane.f32.xlu0 %v763_v43 }
 0x78c   :  { %v762_v44 = vpop.xlane.xlu1 %761 }
 0x78d   :  { %v766_v45 = vmul.f32 %v762_v44, %v1197_v3 }
 0x78f   :  { %v768_v46 = vadd.f32 1e-06, %v766_v45 }
 0x791   :  { %959 = vrsqrt.f32 %v768_v46  ;;  %vm776_vm14 = vweird.f32 %v768_v46 }
 0x794   :  { %v765_v47 = vpop.xlane.xlu0 %764 }
 0x795   :  { %v767_v48 = vmul.f32 %v765_v47, %v1197_v3 }
 0x797   :  { %v960_v49 = vpop.eup %959  ;;  %v769_v50 = vadd.f32 1e-06, %v767_v48 }
 0x798   :  { %v771_v51 = vmul.f32 %v960_v49, %v768_v46  ;;  %vm777_vm13 = vweird.f32 %v960_v49 }
 0x799   :  { %961 = vrsqrt.f32 %v769_v50  ;;  %vm778_vm15 = vmor %vm776_vm14, %vm777_vm13  ;;  %vm786_vm2 = vweird.f32 %v769_v50 }
 0x79a   :  { %v772_v52 = vmul.f32 %v960_v49, %v771_v51 }
 0x79c   :  { %v773_v53 = vmul.f32 0.5, %v772_v52 }
 0x79e   :  { %v774_v54 = vsub.f32 1.5, %v773_v53 }
 0x79f   :  { %v962_v55 = vpop.eup %961 }
 0x7a0   :  { %v775_v56 = vmul.f32 %v960_v49, %v774_v54  ;;  %v781_v57 = vmul.f32 %v962_v55, %v769_v50  ;;  %vm787_vm1 = vweird.f32 %v962_v55 }
 0x7a1   :  { %vm788_vm3 = vmor %vm786_vm2, %vm787_vm1 }
 0x7a2   :  { %v779_v59 = vsel %vm778_vm15, %v960_v49, %v775_v56  ;;  %v782_v60 = vmul.f32 %v962_v55, %v781_v57 }
 0x7a3   :  { %v790_v62 = vmul.f32 %v779_v59, %v756_v36 }
 0x7a4   :  { %v783_v63 = vmul.f32 0.5, %v782_v60 }
 0x7a5   :  { %v793_v3 = vmul.f32 %v919_v58, %v790_v62 }
 0x7a6   :  { %v784_v0 = vsub.f32 1.5, %v783_v63 }
 0x7a7   :  { %v796_v1 = vadd.f32 %v920_v61, %v793_v3 }
 0x7a8   :  { %v785_v2 = vmul.f32 %v962_v55, %v784_v0 }
 0x7a9   :  { %798 = vst.msk [vmem:[#allocation5] sm:$0xff] %vm65_vm0, %v796_v1 }
 0x7aa   :  { %v789_v4 = vsel %vm788_vm3, %v962_v55, %v785_v2 }
 0x7ab   :  { %v791_v8 = vmul.f32 %v789_v4, %v757_v41 }
 0x7ad   :  { %v794_v9 = vmul.f32 %v919_v58, %v791_v8 }
 0x7af   :  { %v797_v10 = vadd.f32 %v920_v61, %v794_v9 }
 0x7b1   :  { %799 = vst.msk [vmem:[#allocation5 + $0x8] sm:$0xff] %vm65_vm0, %v797_v10 }
 0x7b2   :  { %812 = dma.vmem_to_hbm [thread:$0]  %s805_s6, 256, %s807_s9, [#allocation4], %s1033_s10, %s1033_s10, %s1028_s16  }
 0x7b3   :  { %1013 = dma.done.wait [#allocation4], 256  }
 0x7b4   :  { %1014 = vsyncadd [#allocation4], 4294967040 }
 0x7b5   :  { %817 = vsyncpa [#allocation3], 1 }
 0x7b6   :  { %818 = vsyncpa [#allocation4], 1 }

</bundles_post_ra>
